<compile_context>
chip_gen: v7x
topology: tpu7x:2x2x1
jax: 0.10.0
libtpu: 0.0.40
codegen_flags: <defaults>
</compile_context>

<pallas_src>
import jax
import jax.numpy as jnp
from jax.experimental import pallas as pl
from jax.experimental.pallas import tpu as pltpu


def _round_up(x, m):
    return ((x + m - 1) // m) * m


def router_kernel(x_ref, w1_ref, b1_ref, w2_ref, b2_ref, o_ref):
    # x arrives f32 (no wrapper-side cast / extra HBM pass); cast to bf16 here.
    # The VPU cast hides under the MXU; accumulation stays f32.
    x_bf = x_ref[...].astype(jnp.bfloat16)
    h = jnp.dot(x_bf, w1_ref[...], preferred_element_type=jnp.float32)
    # Bias + ReLU in f32 on the VPU (safe on v5e: no bf16 VPU path).
    h = jnp.maximum(h + b1_ref[...], 0.0)
    # Second linear -> lane-padded expert logits; bf16 operands, f32 accum.
    o = jnp.dot(h.astype(w2_ref.dtype), w2_ref[...],
                preferred_element_type=jnp.float32)
    o_ref[...] = (o + b2_ref[...]).astype(o_ref.dtype)


def prepare_router_params(w1, b1, w2, b2):
    """One-time weight prep: bf16 cast + expert-dim zero-pad to a 128-lane multiple.

    Call once at init and cache the result; doing this per-forward adds fixed
    HBM passes over the weights to a memory-bound op.
    Expects pre-transposed weights w1: [H, H], w2: [H, E]; biases 1-D (or [1, -]).
    """
    H, E = w2.shape
    E_pad = _round_up(E, 128)
    w1_bf = w1.astype(jnp.bfloat16)
    w2_bf = jnp.zeros((H, E_pad), jnp.bfloat16).at[:, :E].set(w2.astype(jnp.bfloat16))
    b1_f = b1.astype(jnp.float32).reshape(1, H)
    b2_f = jnp.zeros((1, E_pad), jnp.float32).at[:, :E].set(
        b2.astype(jnp.float32).reshape(1, E))
    return w1_bf, b1_f, w2_bf, b2_f


def router_forward_padded(x2d, params, *, tm=1024, out_dtype=jnp.float32):
    """x2d: [T, H] -> padded logits [T, E_pad] (columns E..E_pad are 0).

    Slice [:, :E] (or mask to -inf) inside the caller's jit so the unpad fuses
    with the downstream softmax/top-k.  out_dtype=jnp.bfloat16 halves logit
    writeback on v5e if downstream tolerates it.
    """
    T, H = x2d.shape
    w1_bf, b1_f, w2_bf, b2_f = params
    E_pad = w2_bf.shape[1]

    # Token tile: as large as possible (amortizes ~0.35us/grid-step overhead),
    # but keep >= 2 grid steps when T is big enough so ("parallel",) can shard
    # the token axis across v7x's two TensorCores.
    tm_cap = _round_up((T + 1) // 2, 16) if T > 16 else _round_up(T, 16)
    tm_eff = max(16, min(tm, tm_cap))
    grid = (pl.cdiv(T, tm_eff),)

    out_itemsize = jnp.dtype(out_dtype).itemsize
    flops = 2 * T * H * (H + E_pad)
    bytes_accessed = (x2d.size * x2d.dtype.itemsize
                      + w1_bf.size * 2 + b1_f.size * 4
                      + w2_bf.size * 2 + b2_f.size * 4
                      + T * E_pad * out_itemsize)

    # VMEM: double-buffered x/out tiles + single-buffered grid-invariant
    # weights/biases, 2x headroom, capped below v7x's 64 MiB ceiling.
    vmem_bytes = (2 * (tm_eff * H * 4 + tm_eff * E_pad * out_itemsize)
                  + (H * H * 2 + H * 4 + H * E_pad * 2 + E_pad * 4))
    vmem_limit = int(min(max(2 * vmem_bytes, 8 << 20), 56 << 20))

    logits_pad = pl.pallas_call(
        router_kernel,
        out_shape=jax.ShapeDtypeStruct((T, E_pad), out_dtype),
        grid_spec=pltpu.PrefetchScalarGridSpec(
            num_scalar_prefetch=0,
            grid=grid,
            in_specs=[
                # x tile (f32, cast in-kernel).  If the x DMA is exposed on v6e
                # at large tm, deepen with pipeline_mode=pl.Buffered(3) here.
                pl.BlockSpec((tm_eff, H), lambda i: (i, 0)),
                # Grid-invariant weights/biases: DMA'd once, single-buffered
                # (halves resident weight VMEM; matters at large H on v7x).
                pl.BlockSpec((H, H), lambda i: (0, 0), pipeline_mode=pl.Buffered(1)),
                pl.BlockSpec((1, H), lambda i: (0, 0), pipeline_mode=pl.Buffered(1)),
                pl.BlockSpec((H, E_pad), lambda i: (0, 0), pipeline_mode=pl.Buffered(1)),
                pl.BlockSpec((1, E_pad), lambda i: (0, 0), pipeline_mode=pl.Buffered(1)),
            ],
            out_specs=pl.BlockSpec((tm_eff, E_pad), lambda i: (i, 0)),
        ),
        compiler_params=pltpu.CompilerParams(
            dimension_semantics=("parallel",),   # shards token grid across TCs on v7x
            vmem_limit_bytes=vmem_limit),
        cost_estimate=pl.CostEstimate(
            flops=flops, transcendentals=0, bytes_accessed=bytes_accessed),
    )(x2d, w1_bf, b1_f, w2_bf, b2_f)
    return logits_pad


def router_apply(x, params, num_experts, *, tm=1024):
    """Full Router forward: flatten leading dims, run kernel, unpad + reshape.

    Intended to be called under jit so the unpad slice fuses with downstream
    consumers (softmax / top-k) rather than costing a separate HBM pass.
    """
    H = x.shape[-1]
    x2d = x.reshape(-1, H)
    logits_pad = router_forward_padded(x2d, params, tm=tm)
    return logits_pad[:, :num_experts].reshape(*x.shape[:-1], num_experts)


def init_router_params(key, hidden_dim, num_experts, dtype=jnp.float32):
    """Deterministic init mimicking PyTorch Linear's U(-1/sqrt(fan_in), +1/sqrt(fan_in))."""
    k1, k2, k3, k4 = jax.random.split(key, 4)
    bound = 1.0 / (hidden_dim ** 0.5)
    # Stored pre-transposed: [in, out]
    w1 = jax.random.uniform(k1, (hidden_dim, hidden_dim), dtype, -bound, bound)
    b1 = jax.random.uniform(k2, (hidden_dim,), dtype, -bound, bound)
    w2 = jax.random.uniform(k3, (hidden_dim, num_experts), dtype, -bound, bound)
    b2 = jax.random.uniform(k4, (num_experts,), dtype, -bound, bound)
    return w1, b1, w2, b2


if __name__ == "__main__":
    # Small shapes consistent with Router(hidden_dim, num_experts):
    batch, seq, hidden_dim, num_experts = 2, 8, 32, 4

    key = jax.random.PRNGKey(0)
    kx, kp = jax.random.split(key)
    x = jax.random.normal(kx, (batch, seq, hidden_dim), dtype=jnp.float32)
    w1, b1, w2, b2 = init_router_params(kp, hidden_dim, num_experts)

    # One-time weight prep (cached; no per-forward weight casting/padding).
    params = prepare_router_params(w1, b1, w2, b2)

    # Whole forward under one jit so the unpad slice fuses into the caller graph.
    fwd = jax.jit(lambda xx: router_apply(xx, params, num_experts))
    logits = fwd(x)
    jax.block_until_ready(logits)
    assert logits.shape == (batch, seq, num_experts)

    # Reference replicating the kernel numerics (bf16 matmul operands, f32 accum).
    x2d = x.reshape(-1, hidden_dim)
    h_ref = jnp.maximum(
        jnp.dot(x2d.astype(jnp.bfloat16), w1.astype(jnp.bfloat16),
                preferred_element_type=jnp.float32) + b1.reshape(1, -1), 0.0)
    ref2d = jnp.dot(h_ref.astype(jnp.bfloat16), w2.astype(jnp.bfloat16),
                    preferred_element_type=jnp.float32) + b2.reshape(1, -1)
    ref = ref2d.reshape(batch, seq, num_experts)
    assert jnp.allclose(logits, ref, atol=1e-3, rtol=1e-3)

    # Loose sanity check vs. full-f32 math (bf16 operand rounding only).
    ref_f32 = (jnp.maximum(x2d @ w1 + b1.reshape(1, -1), 0.0) @ w2
               + b2.reshape(1, -1)).reshape(batch, seq, num_experts)
    assert jnp.allclose(logits, ref_f32, atol=5e-2, rtol=5e-2)

    print("KERNEL_OK")
</pallas_src>

<mosaic_0001>
module attributes {stable_mosaic.version = 11 : i64} {
  func.func @router_kernel(%arg0: i32, %arg1: memref<16x32xf32, #tpu.memory_space<vmem>>, %arg2: memref<32x32xbf16, #tpu.memory_space<vmem>>, %arg3: memref<1x32xf32, #tpu.memory_space<vmem>>, %arg4: memref<32x128xbf16, #tpu.memory_space<vmem>>, %arg5: memref<1x128xf32, #tpu.memory_space<vmem>>, %arg6: memref<16x128xf32, #tpu.memory_space<vmem>>) attributes {dimension_semantics = [#tpu.dimension_semantics<parallel>], iteration_bounds = array<i64: 1>, scalar_prefetch = 0 : i64, scratch_operands = 0 : i64, tpu.core_type = #tpu.core_type<tc>, window_params = [{transform_indices = @transform_0, window_bounds = array<i64: 16, 32>}, {pipeline_mode = #tpu.pipeline_mode<synchronous>, transform_indices = @transform_1, window_bounds = array<i64: 32, 32>}, {pipeline_mode = #tpu.pipeline_mode<synchronous>, transform_indices = @transform_2, window_bounds = array<i64: 1, 32>}, {pipeline_mode = #tpu.pipeline_mode<synchronous>, transform_indices = @transform_3, window_bounds = array<i64: 32, 128>}, {pipeline_mode = #tpu.pipeline_mode<synchronous>, transform_indices = @transform_4, window_bounds = array<i64: 1, 128>}, {transform_indices = @transform_5, window_bounds = array<i64: 16, 128>}]} {
    %c0 = arith.constant 0 : index
    %c0_0 = arith.constant 0 : index
    %0 = vector.load %arg1[%c0, %c0_0] : memref<16x32xf32, #tpu.memory_space<vmem>>, vector<16x32xf32>
    %1 = arith.truncf %0 : vector<16x32xf32> to vector<16x32xbf16>
    %c0_1 = arith.constant 0 : index
    %c0_2 = arith.constant 0 : index
    %2 = vector.load %arg2[%c0_1, %c0_2] : memref<32x32xbf16, #tpu.memory_space<vmem>>, vector<32x32xbf16>
    %cst = arith.constant dense<0.000000e+00> : vector<16x32xf32>
    %3 = tpu.matmul %1, %2, %cst {dimension_numbers = #tpu.dot_dimension_numbers<[1], [0], [0], [1], [0, 0, 1, 1], [], []>} : vector<16x32xbf16>, vector<32x32xbf16>, vector<16x32xf32> -> vector<16x32xf32>
    %c0_3 = arith.constant 0 : index
    %c0_4 = arith.constant 0 : index
    %4 = vector.load %arg3[%c0_3, %c0_4] : memref<1x32xf32, #tpu.memory_space<vmem>>, vector<1x32xf32>
    %5 = vector.broadcast %4 : vector<1x32xf32> to vector<16x32xf32>
    %6 = arith.addf %3, %5 : vector<16x32xf32>
    %cst_5 = arith.constant 0.000000e+00 : f32
    %7 = vector.broadcast %cst_5 : f32 to vector<16x32xf32>
    %8 = arith.maximumf %6, %7 : vector<16x32xf32>
    %9 = arith.truncf %8 : vector<16x32xf32> to vector<16x32xbf16>
    %c0_6 = arith.constant 0 : index
    %c0_7 = arith.constant 0 : index
    %10 = vector.load %arg4[%c0_6, %c0_7] : memref<32x128xbf16, #tpu.memory_space<vmem>>, vector<32x128xbf16>
    %cst_8 = arith.constant dense<0.000000e+00> : vector<16x128xf32>
    %11 = tpu.matmul %9, %10, %cst_8 {dimension_numbers = #tpu.dot_dimension_numbers<[1], [0], [0], [1], [0, 0, 1, 1], [], []>} : vector<16x32xbf16>, vector<32x128xbf16>, vector<16x128xf32> -> vector<16x128xf32>
    %c0_9 = arith.constant 0 : index
    %c0_10 = arith.constant 0 : index
    %12 = vector.load %arg5[%c0_9, %c0_10] : memref<1x128xf32, #tpu.memory_space<vmem>>, vector<1x128xf32>
    %13 = vector.broadcast %12 : vector<1x128xf32> to vector<16x128xf32>
    %14 = arith.addf %11, %13 : vector<16x128xf32>
    %c0_11 = arith.constant 0 : index
    %c0_12 = arith.constant 0 : index
    %15 = vector.load %arg6[%c0_11, %c0_12] : memref<16x128xf32, #tpu.memory_space<vmem>>, vector<16x128xf32>
    tpu.vector_store %arg6[%c0_11, %c0_12], %14 {strides = array<i32>} : memref<16x128xf32, #tpu.memory_space<vmem>>, vector<16x128xf32>,
    return
  }
  func.func @transform_0(%arg0: i32) -> (i32, i32) {
    %c0_i32 = arith.constant 0 : i32
    %c0_i32_0 = arith.constant 0 : i32
    return %arg0, %c0_i32 : i32, i32
  }
  func.func @transform_1(%arg0: i32) -> (i32, i32) {
    %c0_i32 = arith.constant 0 : i32
    %c0_i32_0 = arith.constant 0 : i32
    %c0_i32_1 = arith.constant 0 : i32
    return %c0_i32, %c0_i32_0 : i32, i32
  }
  func.func @transform_2(%arg0: i32) -> (i32, i32) {
    %c0_i32 = arith.constant 0 : i32
    %c0_i32_0 = arith.constant 0 : i32
    %c0_i32_1 = arith.constant 0 : i32
    return %c0_i32, %c0_i32_0 : i32, i32
  }
  func.func @transform_3(%arg0: i32) -> (i32, i32) {
    %c0_i32 = arith.constant 0 : i32
    %c0_i32_0 = arith.constant 0 : i32
    %c0_i32_1 = arith.constant 0 : i32
    return %c0_i32, %c0_i32_0 : i32, i32
  }
  func.func @transform_4(%arg0: i32) -> (i32, i32) {
    %c0_i32 = arith.constant 0 : i32
    %c0_i32_0 = arith.constant 0 : i32
    %c0_i32_1 = arith.constant 0 : i32
    return %c0_i32, %c0_i32_0 : i32, i32
  }
  func.func @transform_5(%arg0: i32) -> (i32, i32) {
    %c0_i32 = arith.constant 0 : i32
    %c0_i32_0 = arith.constant 0 : i32
    return %arg0, %c0_i32 : i32, i32
  }
}

</mosaic_0001>

<bundles_post_ra>
// kernel: _lambda_.1
= control target key start
LH: loop header
LB: loop body
LE: loop exit
PB: predicated region body
PF: predicated region fallthrough
CT: control target
= control target key end

     0   :  { %10 = vsyncpa [#allocation3], 0  ;;  %s370_s0 = inlined_call_operand.hbm [shape: f32[16,32], index: 0, kind: input, shape index: {}]   ;;  %s371_s1 = inlined_call_operand.hbm [shape: bf16[32,32], index: 1, kind: input, shape index: {}]   ;;  %s372_s2 = inlined_call_operand.vmem [shape: f32[1,32], index: 2, kind: input, shape index: {}]   ;;  %s373_s3 = inlined_call_operand.vmem [shape: bf16[32,128], index: 3, kind: input, shape index: {}]   ;;  %s374_s4 = inlined_call_operand.vmem [shape: f32[1,128], index: 4, kind: input, shape index: {}]   ;;  %s375_s5 = inlined_call_operand.vmem [shape: f32[16,128], index: 5, kind: output, shape index: {}]  }
   0x1   :  { %11 = vsyncpa [#allocation5], 0  ;;  %s288_s18 = smov [#allocation2]   ;;  %s240_s22 = scalar_lea.hbm %s370_s0, 256 }
   0x2   :  { %s17_s19 = sshll.u32 %s288_s18, 4  ;;  %p241_p0 = scmp.ne.s32.totalorder %s370_s0, %s240_s22  ;;  %s18_s19 = int_to_ptr.vmem [resolvable:$true] %s17_s19 }
   0x3   :  { %p244_p1 = scmp.lt.u32.totalorder %s240_s22, %s370_s0 }
   0x5   :  { %p246_p2 = pnand %p244_p1, %p241_p0 }
   0x7   :  { %249 = shalt.err (!%p246_p2)
}
   0x8   :  { %s250_s27 = scalar_lea.vmem %s18_s19, 256  ;;  %p255_p4 = scmp.lt.s32.totalorder %s18_s19, %s18_s19 }
   0x9   :  { %p251_p3 = scmp.ne.s32.totalorder %s18_s19, %s250_s27  ;;  %p256_p5 = scmp.lt.s32.totalorder %s250_s27, %s250_s27 }
   0xb   :  { %p257_p6 = por %p256_p5, %p255_p4 }
   0xd   :  { %p258_p7 = pnand %p257_p6, %p251_p3 }
   0xf   :  { %261 = shalt.err (!%p258_p7)
}
  0x10   :  { %s289_s28 = smov 128   ;;  %s290_s29 = smov 8  }
  0x11   :  { %23 = dma.hbm_to_vmem [thread:$0]  %s370_s0, 256, %s18_s19, [#allocation3], %s289_s28, %s289_s28, %s290_s29  }
  0x12   :  { %s291_s7 = smov [#allocation4]   ;;  %s262_s11 = scalar_lea.hbm %s371_s1, 256 }
  0x13   :  { %s29_s8 = sshll.u32 %s291_s7, 4  ;;  %p263_p8 = scmp.ne.s32.totalorder %s371_s1, %s262_s11  ;;  %s30_s8 = int_to_ptr.vmem [resolvable:$true] %s29_s8 }
  0x14   :  { %p266_p9 = scmp.lt.u32.totalorder %s262_s11, %s371_s1 }
  0x16   :  { %p268_p10 = pnand %p266_p9, %p263_p8 }
  0x18   :  { %271 = shalt.err (!%p268_p10)
}
  0x19   :  { %s272_s16 = scalar_lea.vmem %s30_s8, 256  ;;  %p277_p12 = scmp.lt.s32.totalorder %s30_s8, %s30_s8 }
  0x1a   :  { %p273_p11 = scmp.ne.s32.totalorder %s30_s8, %s272_s16  ;;  %p278_p13 = scmp.lt.s32.totalorder %s272_s16, %s272_s16 }
  0x1c   :  { %p279_p0 = por %p278_p13, %p277_p12 }
  0x1e   :  { %p280_p1 = pnand %p279_p0, %p273_p11 }
  0x20   :  { %283 = shalt.err (!%p280_p1)
}
  0x21   :  { %s292_s0 = smov 64   ;;  %s293_s17 = smov 4  }
  0x22   :  { %35 = dma.hbm_to_vmem [thread:$0]  %s371_s1, 256, %s30_s8, [#allocation5], %s292_s0, %s292_s0, %s293_s17  }
  0x23   :  { %284 = dma.done.wait [#allocation3], 256  }
  0x24   :  { %285 = vsyncadd [#allocation3], 4294967040 }
  0x25   :  { %286 = dma.done.wait [#allocation5], 256  }
  0x26   :  { %287 = vsyncadd [#allocation5], 4294967040  ;;  %v294_v0 = vmov 0.0   ;;  %vm295_vm0 = vmmov 0   ;;  %v236_v1 = vld [vmem:[#allocation4] sm:$0xff]   ;;  %v237_v2 = vld [vmem:[#allocation4 + $0x8] sm:$0xff]  }
  0x27   :  { %212 = vmatprep.subr.bf16.mxu0 %v294_v0  ;;  %216 = vmatprep.mubr.msk.bf16.mxu0 %vm295_vm0, %v294_v0  ;;  %v49_v3 = vld [vmem:[#allocation2] sm:$0xff]  ;;  %v50_v4 = vld [vmem:[#allocation2 + $0x8] sm:$0xff]  ;;  %vm75_vm1 = vcmask 261120  }
  0x28   :  { %220 = vmatprep.subr.bf16.mxu1 %v294_v0  ;;  %224 = vmatprep.mubr.msk.bf16.mxu1 %vm295_vm0, %v294_v0  ;;  %v51_v5 = vpack.c.bf16 %v50_v4, %v49_v3  ;;  %v238_v6 = vld [vmem:[%s373_s3] sm:$0xff]   ;;  %v239_v7 = vld [vmem:[%s373_s3 + $0x8] sm:$0xff]  }
  0x29   :  { %213 = vmatpush3.bf16.msra.mxu0 %v236_v1  ;;  %221 = vmatpush3.bf16.msra.mxu1 %v238_v6  ;;  %v198_v8 = vld [vmem:[%s372_s2] ss:$0 sm:$0xff] }
  0x2a   :  { %214 = vmatprep.subr.bf16.mxu0 %v294_v0  ;;  %222 = vmatprep.subr.bf16.mxu1 %v294_v0  ;;  %v202_v18 = vld [vmem:[%s374_s4] ss:$0 sm:$0xff] }
  0x2d   :  { %215 = vmatpush3.bf16.msra.mxu0 %v237_v2  ;;  %223 = vmatpush3.bf16.msra.mxu1 %v239_v7 }
  0x30   :  { %217 = vmatmul.mubr.msk.bf16.vlgmr.msra.gmra.mrb[0].mxu0 %vm75_vm1, %v51_v5 }
 0x103   :  { %v113_v9 = vpop.f32.mrb[0].mxu0 }
 0x104   :  { %v114_v10 = vadd.f32 %v198_v8, %v113_v9  ;;  %v218_v11 = vpop.f32.mrb[1].mxu0 }
 0x105   :  { %v116_v12 = vpop.f32.mrb[2].mxu0 }
 0x106   :  { %v117_v13 = vadd.f32 %v198_v8, %v116_v12  ;;  %v219_v14 = vpop.f32.mrb[3].mxu0  ;;  %v120_v15 = vmax.f32 %v114_v10, 0.0 }
 0x108   :  { %v121_v16 = vmax.f32 %v117_v13, 0.0 }
 0x10a   :  { %v122_v17 = vpack.c.bf16 %v121_v16, %v120_v15 }
 0x10c   :  { %225 = vmatmul.mubr.msk.bf16.vlgmr.msra.gmra.mrb[0].mxu1 %vm75_vm1, %v122_v17 }
 0x1df   :  { %v183_v19 = vpop.f32.mrb[0].mxu1 }
 0x1e0   :  { %v184_v20 = vadd.f32 %v202_v18, %v183_v19  ;;  %v226_v21 = vpop.f32.mrb[1].mxu1 }
 0x1e1   :  { %v186_v22 = vpop.f32.mrb[2].mxu1 }
 0x1e2   :  { %190 = vst [vmem:[%s375_s5] sm:$0xff] %v184_v20  ;;  %v187_v23 = vadd.f32 %v202_v18, %v186_v22  ;;  %v227_v24 = vpop.f32.mrb[3].mxu1 }
 0x1e4   :  { %191 = vst [vmem:[%s375_s5 + $0x8] sm:$0xff] %v187_v23 }
 0x1e5   :  { %196 = vsyncpa [#allocation3], 1 }
 0x1e6   :  { %197 = vsyncpa [#allocation5], 1 }

</bundles_post_ra>
